<compile_context>
chip_gen: v7x
topology: tpu7x:2x2x1
jax: 0.10.0
libtpu: 0.0.40
codegen_flags: <defaults>
</compile_context>

<pallas_src>
import functools

import jax
import jax.numpy as jnp
from jax.experimental import pallas as pl
from jax.experimental.pallas import tpu as pltpu


def _round_up(x, m):
    return ((x + m - 1) // m) * m


def _linear_encoder_kernel(x_ref, w_ref, b_ref, eps_ref,
                           q_m_ref, q_v_ref, latent_ref,
                           *, n_out, var_eps, apply_softmax):
    n_out_p = q_m_ref.shape[-1]

    # Single fused MXU matmul: [x @ W_mean | x @ W_var] (K = n_in is tiny, one push/drain).
    fused = jnp.dot(x_ref[...], w_ref[...], preferred_element_type=jnp.float32)
    fused = fused + b_ref[...]                      # (1, 2*n_out_p) broadcast over rows

    # Mean head -> store immediately (shrinks the live vreg/VMEM set).
    q_m = fused[:, :n_out_p]
    q_m_ref[...] = q_m.astype(q_m_ref.dtype)

    # Variance head.
    q_v = jnp.exp(fused[:, n_out_p:]) + var_eps
    q_v_ref[...] = q_v.astype(q_v_ref.dtype)

    # Reparameterized sample: q_m + sqrt(q_v) * eps  (eps is standard-normal noise).
    latent = q_m + jnp.sqrt(q_v) * eps_ref[...].astype(jnp.float32)

    if apply_softmax:  # distribution == 'ln'
        if n_out != n_out_p:
            # Mask lane-padding columns out of the softmax.
            col = jax.lax.broadcasted_iota(jnp.int32, latent.shape, 1)
            latent = jnp.where(col < n_out, latent, -1e30)
        m = jnp.max(latent, axis=-1, keepdims=True)
        e = jnp.exp(latent - m)
        denom = jnp.sum(e, axis=-1, keepdims=True)
        r = pl.reciprocal(denom, approx=True)       # EUP slot
        r = r * (2.0 - denom * r)                   # one Newton step -> ~f32 accuracy
        latent = e * r

    latent_ref[...] = latent.astype(latent_ref.dtype)


def linear_encoder_forward(x, w_mean, b_mean, w_var, b_var, *,
                           eps=None, key=None,
                           distribution="normal", var_eps=1e-4,
                           bm=256, out_dtype=None,
                           vmem_budget_bytes=40 * 1024 * 1024):
    """Fused Pallas-TPU forward of LinearEncoder.

    Args:
      x:       (B, n_input)
      w_mean:  (n_input, n_output)  pre-transposed weight of `mean`
      b_mean:  (n_output,)
      w_var:   (n_input, n_output)  pre-transposed weight of `var`
      b_var:   (n_output,)
      eps:     optional (B, n_output) standard-normal noise (the rsample draw).
               If None it is generated from `key` (default PRNGKey(0)).
      distribution: 'normal' (identity) or 'ln' (softmax over last dim).
      out_dtype: dtype of the three outputs (default: x.dtype; bf16 halves writeback).

    Returns:
      (q_m, q_v, latent), each (B, n_output).
    """
    B, n_in = x.shape
    n_out = w_mean.shape[1]
    assert w_var.shape == (n_in, n_out)
    out_dtype = x.dtype if out_dtype is None else out_dtype

    # Pad n_out to a lane-dense multiple of 128 -> unmasked vst on every output store.
    n_out_p = max(128, _round_up(n_out, 128))
    pad_o = n_out_p - n_out

    x_bytes = jnp.dtype(x.dtype).itemsize
    w_bytes = jnp.dtype(w_mean.dtype).itemsize
    o_bytes = jnp.dtype(out_dtype).itemsize

    def vmem_est(tile):
        ins = (2 * tile * n_in * x_bytes                 # x (double-buffered)
               + 2 * n_in * 2 * n_out_p * w_bytes        # fused weights
               + 2 * 2 * n_out_p * 4                     # fused bias
               + 2 * tile * n_out_p * 4)                 # eps
        outs = 2 * 3 * tile * n_out_p * o_bytes          # 3 double-buffered outputs
        tmps = 8 * tile * n_out_p * 4                    # f32 intermediates
        return ins + outs + tmps

    # Large batch tile, but auto-shrink until it fits the VMEM budget (safe on v7x's 64 MiB/TC).
    bm_eff = min(max(8, _round_up(bm, 8)), _round_up(B, 8))
    while bm_eff > 8 and vmem_est(bm_eff) > vmem_budget_bytes:
        bm_eff = max(8, _round_up(bm_eff // 2, 8))

    B_p = _round_up(B, bm_eff)

    # Wrapper-side padding (replaces the old `assert B % bm == 0`).
    x_p = jnp.pad(x, ((0, B_p - B), (0, 0))) if B_p != B else x
    w_fused = jnp.concatenate(
        [jnp.pad(w_mean, ((0, 0), (0, pad_o))),
         jnp.pad(w_var, ((0, 0), (0, pad_o)))], axis=1)
    b_fused = jnp.concatenate(
        [jnp.pad(b_mean, (0, pad_o)), jnp.pad(b_var, (0, pad_o))]
    ).reshape(1, 2 * n_out_p).astype(jnp.float32)

    if eps is None:
        # TODO(synk): switch to in-kernel pltpu.prng_seed/stateful_normal to drop this HBM read.
        if key is None:
            key = jax.random.PRNGKey(0)
        eps_p = jax.random.normal(key, (B_p, n_out_p), dtype=jnp.float32)
    else:
        eps_p = jnp.pad(eps.astype(jnp.float32), ((0, B_p - B), (0, pad_o)))

    grid = (B_p // bm_eff,)
    kernel = functools.partial(
        _linear_encoder_kernel,
        n_out=n_out, var_eps=float(var_eps),
        apply_softmax=(distribution == "ln"))

    flops = 2 * B_p * n_in * (2 * n_out_p)
    transcendentals = B_p * n_out_p * (2 if distribution == "ln" else 1)
    bytes_accessed = (x_p.size * x_bytes + w_fused.size * w_bytes
                      + b_fused.size * 4 + eps_p.size * 4
                      + 3 * B_p * n_out_p * o_bytes)
    vmem_limit = int(min(64 * 1024 * 1024,
                         max(32 * 1024 * 1024, 2 * vmem_est(bm_eff))))

    out_shape = tuple(jax.ShapeDtypeStruct((B_p, n_out_p), out_dtype) for _ in range(3))

    q_m, q_v, latent = pl.pallas_call(
        kernel,
        out_shape=out_shape,
        grid_spec=pltpu.PrefetchScalarGridSpec(
            num_scalar_prefetch=0,
            grid=grid,
            in_specs=[
                pl.BlockSpec((bm_eff, n_in), lambda i: (i, 0)),       # x tile
                pl.BlockSpec((n_in, 2 * n_out_p), lambda i: (0, 0)),  # fused weights (resident)
                pl.BlockSpec((1, 2 * n_out_p), lambda i: (0, 0)),     # fused bias (resident)
                pl.BlockSpec((bm_eff, n_out_p), lambda i: (i, 0)),    # eps tile
            ],
            out_specs=[
                pl.BlockSpec((bm_eff, n_out_p), lambda i: (i, 0)),    # q_m
                pl.BlockSpec((bm_eff, n_out_p), lambda i: (i, 0)),    # q_v
                pl.BlockSpec((bm_eff, n_out_p), lambda i: (i, 0)),    # latent
            ],
        ),
        compiler_params=pltpu.CompilerParams(
            dimension_semantics=("parallel",),
            vmem_limit_bytes=vmem_limit),
        cost_estimate=pl.CostEstimate(
            flops=flops, transcendentals=transcendentals,
            bytes_accessed=bytes_accessed),
    )(x_p, w_fused, b_fused, eps_p)

    if B_p != B or n_out_p != n_out:
        q_m = q_m[:B, :n_out]
        q_v = q_v[:B, :n_out]
        latent = latent[:B, :n_out]
    return q_m, q_v, latent


if __name__ == "__main__":
    master_key = jax.random.PRNGKey(0)
    VAR_EPS = 1e-4

    def ref_forward(x, w_m, b_m, w_v, b_v, eps, distribution):
        q_m = x @ w_m + b_m
        q_v = jnp.exp(x @ w_v + b_v) + VAR_EPS
        latent = q_m + jnp.sqrt(q_v) * eps
        if distribution == "ln":
            latent = jax.nn.softmax(latent, axis=-1)
        return q_m, q_v, latent

    def run_case(case_key, B, n_in, n_out, distribution):
        ks = jax.random.split(case_key, 6)
        x = jax.random.normal(ks[0], (B, n_in), dtype=jnp.float32)
        bound = 1.0 / (n_in ** 0.5)
        w_m = jax.random.uniform(ks[1], (n_in, n_out), minval=-bound, maxval=bound,
                                 dtype=jnp.float32)
        b_m = jax.random.uniform(ks[2], (n_out,), minval=-bound, maxval=bound,
                                 dtype=jnp.float32)
        w_v = jax.random.uniform(ks[3], (n_in, n_out), minval=-bound, maxval=bound,
                                 dtype=jnp.float32)
        b_v = jax.random.uniform(ks[4], (n_out,), minval=-bound, maxval=bound,
                                 dtype=jnp.float32)
        eps = jax.random.normal(ks[5], (B, n_out), dtype=jnp.float32)

        q_m, q_v, latent = linear_encoder_forward(
            x, w_m, b_m, w_v, b_v, eps=eps,
            distribution=distribution, var_eps=VAR_EPS)
        jax.block_until_ready((q_m, q_v, latent))

        q_m_r, q_v_r, lat_r = ref_forward(x, w_m, b_m, w_v, b_v, eps, distribution)
        assert q_m.shape == (B, n_out) and q_v.shape == (B, n_out) and latent.shape == (B, n_out)
        assert jnp.allclose(q_m, q_m_r, atol=1e-4, rtol=1e-4)
        assert jnp.allclose(q_v, q_v_r, atol=1e-4, rtol=1e-4)
        assert jnp.allclose(latent, lat_r, atol=1e-4, rtol=1e-4)

    k1, k2 = jax.random.split(master_key)
    # 'normal' (identity transform), lane-aligned n_out
    run_case(k1, B=8, n_in=32, n_out=256, distribution="normal")
    # 'ln' (softmax), non-multiple-of-128 n_out + non-multiple-of-tile batch (exercises padding/masking)
    run_case(k2, B=12, n_in=32, n_out=200, distribution="ln")

    print("KERNEL_OK")
</pallas_src>

<mosaic_0001>
module attributes {stable_mosaic.version = 11 : i64} {
  func.func @_linear_encoder_kernel(%arg0: i32, %arg1: memref<8x32xf32, #tpu.memory_space<vmem>>, %arg2: memref<32x512xf32, #tpu.memory_space<vmem>>, %arg3: memref<1x512xf32, #tpu.memory_space<vmem>>, %arg4: memref<8x256xf32, #tpu.memory_space<vmem>>, %arg5: memref<8x256xf32, #tpu.memory_space<vmem>>, %arg6: memref<8x256xf32, #tpu.memory_space<vmem>>, %arg7: memref<8x256xf32, #tpu.memory_space<vmem>>) attributes {dimension_semantics = [#tpu.dimension_semantics<parallel>], iteration_bounds = array<i64: 1>, scalar_prefetch = 0 : i64, scratch_operands = 0 : i64, tpu.core_type = #tpu.core_type<tc>, window_params = [{transform_indices = @transform_0, window_bounds = array<i64: 8, 32>}, {pipeline_mode = #tpu.pipeline_mode<synchronous>, transform_indices = @transform_1, window_bounds = array<i64: 32, 512>}, {pipeline_mode = #tpu.pipeline_mode<synchronous>, transform_indices = @transform_2, window_bounds = array<i64: 1, 512>}, {transform_indices = @transform_3, window_bounds = array<i64: 8, 256>}, {transform_indices = @transform_4, window_bounds = array<i64: 8, 256>}, {transform_indices = @transform_5, window_bounds = array<i64: 8, 256>}, {transform_indices = @transform_6, window_bounds = array<i64: 8, 256>}]} {
    %c0 = arith.constant 0 : index
    %c0_0 = arith.constant 0 : index
    %0 = vector.load %arg1[%c0, %c0_0] : memref<8x32xf32, #tpu.memory_space<vmem>>, vector<8x32xf32>
    %c0_1 = arith.constant 0 : index
    %c0_2 = arith.constant 0 : index
    %1 = vector.load %arg2[%c0_1, %c0_2] : memref<32x512xf32, #tpu.memory_space<vmem>>, vector<32x512xf32>
    %cst = arith.constant dense<0.000000e+00> : vector<8x512xf32>
    %2 = tpu.matmul %0, %1, %cst {dimension_numbers = #tpu.dot_dimension_numbers<[1], [0], [0], [1], [0, 0, 1, 1], [], []>} : vector<8x32xf32>, vector<32x512xf32>, vector<8x512xf32> -> vector<8x512xf32>
    %c0_3 = arith.constant 0 : index
    %c0_4 = arith.constant 0 : index
    %3 = vector.load %arg3[%c0_3, %c0_4] : memref<1x512xf32, #tpu.memory_space<vmem>>, vector<1x512xf32>
    %4 = vector.broadcast %3 : vector<1x512xf32> to vector<8x512xf32>
    %5 = arith.addf %2, %4 : vector<8x512xf32>
    %6 = vector.extract_strided_slice %5 {offsets = [0, 0], sizes = [8, 256], strides = [1, 1]} : vector<8x512xf32> to vector<8x256xf32>
    %c0_5 = arith.constant 0 : index
    %c0_6 = arith.constant 0 : index
    %7 = vector.load %arg5[%c0_5, %c0_6] : memref<8x256xf32, #tpu.memory_space<vmem>>, vector<8x256xf32>
    tpu.vector_store %arg5[%c0_5, %c0_6], %6 {strides = array<i32>} : memref<8x256xf32, #tpu.memory_space<vmem>>, vector<8x256xf32>,
    %8 = vector.extract_strided_slice %5 {offsets = [0, 256], sizes = [8, 256], strides = [1, 1]} : vector<8x512xf32> to vector<8x256xf32>
    %9 = math.exp %8 : vector<8x256xf32>
    %cst_7 = arith.constant 9.99999974E-5 : f32
    %10 = vector.broadcast %cst_7 : f32 to vector<8x256xf32>
    %11 = arith.addf %9, %10 : vector<8x256xf32>
    %c0_8 = arith.constant 0 : index
    %c0_9 = arith.constant 0 : index
    %12 = vector.load %arg6[%c0_8, %c0_9] : memref<8x256xf32, #tpu.memory_space<vmem>>, vector<8x256xf32>
    tpu.vector_store %arg6[%c0_8, %c0_9], %11 {strides = array<i32>} : memref<8x256xf32, #tpu.memory_space<vmem>>, vector<8x256xf32>,
    %13 = math.sqrt %11 : vector<8x256xf32>
    %c0_10 = arith.constant 0 : index
    %c0_11 = arith.constant 0 : index
    %14 = vector.load %arg4[%c0_10, %c0_11] : memref<8x256xf32, #tpu.memory_space<vmem>>, vector<8x256xf32>
    %15 = arith.mulf %13, %14 : vector<8x256xf32>
    %16 = arith.addf %6, %15 : vector<8x256xf32>
    %c0_12 = arith.constant 0 : index
    %c0_13 = arith.constant 0 : index
    %17 = vector.load %arg7[%c0_12, %c0_13] : memref<8x256xf32, #tpu.memory_space<vmem>>, vector<8x256xf32>
    tpu.vector_store %arg7[%c0_12, %c0_13], %16 {strides = array<i32>} : memref<8x256xf32, #tpu.memory_space<vmem>>, vector<8x256xf32>,
    return
  }
  func.func @transform_0(%arg0: i32) -> (i32, i32) {
    %c0_i32 = arith.constant 0 : i32
    %c0_i32_0 = arith.constant 0 : i32
    return %arg0, %c0_i32 : i32, i32
  }
  func.func @transform_1(%arg0: i32) -> (i32, i32) {
    %c0_i32 = arith.constant 0 : i32
    %c0_i32_0 = arith.constant 0 : i32
    %c0_i32_1 = arith.constant 0 : i32
    return %c0_i32, %c0_i32_0 : i32, i32
  }
  func.func @transform_2(%arg0: i32) -> (i32, i32) {
    %c0_i32 = arith.constant 0 : i32
    %c0_i32_0 = arith.constant 0 : i32
    %c0_i32_1 = arith.constant 0 : i32
    return %c0_i32, %c0_i32_0 : i32, i32
  }
  func.func @transform_3(%arg0: i32) -> (i32, i32) {
    %c0_i32 = arith.constant 0 : i32
    %c0_i32_0 = arith.constant 0 : i32
    return %arg0, %c0_i32 : i32, i32
  }
  func.func @transform_4(%arg0: i32) -> (i32, i32) {
    %c0_i32 = arith.constant 0 : i32
    %c0_i32_0 = arith.constant 0 : i32
    return %arg0, %c0_i32 : i32, i32
  }
  func.func @transform_5(%arg0: i32) -> (i32, i32) {
    %c0_i32 = arith.constant 0 : i32
    %c0_i32_0 = arith.constant 0 : i32
    return %arg0, %c0_i32 : i32, i32
  }
  func.func @transform_6(%arg0: i32) -> (i32, i32) {
    %c0_i32 = arith.constant 0 : i32
    %c0_i32_0 = arith.constant 0 : i32
    return %arg0, %c0_i32 : i32, i32
  }
}

</mosaic_0001>

<bundles_post_ra>
// kernel: tpu_custom_call.1
= control target key start
LH: loop header
LB: loop body
LE: loop exit
PB: predicated region body
PF: predicated region fallthrough
CT: control target
= control target key end

     0   :  { %12 = vsyncpa [#allocation3], 0  ;;  %s621_s0 = inlined_call_operand.hbm [shape: f32[8,32], index: 0, kind: input, shape index: {}]   ;;  %s622_s1 = inlined_call_operand.hbm [shape: f32[32,512], index: 1, kind: input, shape index: {}]   ;;  %s623_s2 = inlined_call_operand.vmem [shape: f32[1,512], index: 2, kind: input, shape index: {}]   ;;  %s624_s3 = inlined_call_operand.hbm [shape: f32[8,256], index: 3, kind: input, shape index: {}]   ;;  %s625_s4 = inlined_call_operand.hbm [shape: f32[8,256], index: 4, kind: output, shape index: {0}]   ;;  %s626_s5 = inlined_call_operand.hbm [shape: f32[8,256], index: 5, kind: output, shape index: {1}]   ;;  %s627_s6 = inlined_call_operand.hbm [shape: f32[8,256], index: 6, kind: output, shape index: {2}]  }
   0x1   :  { %13 = vsyncpa [#allocation6], 0 }
   0x2   :  { %14 = vsyncpa [#allocation4], 0 }
   0x3   :  { %15 = vsyncpa [#allocation10], 0  ;;  %s494_s21 = smov [#allocation5]   ;;  %s354_s25 = scalar_lea.hbm %s622_s1, 2048 }
   0x4   :  { %s31_s22 = sshll.u32 %s494_s21, 4  ;;  %p355_p0 = scmp.ne.s32.totalorder %s622_s1, %s354_s25  ;;  %s32_s22 = int_to_ptr.vmem [resolvable:$true] %s31_s22 }
   0x5   :  { %p358_p1 = scmp.lt.u32.totalorder %s354_s25, %s622_s1 }
   0x7   :  { %p360_p2 = pnand %p358_p1, %p355_p0 }
   0x9   :  { %363 = shalt.err (!%p360_p2)
}
   0xa   :  { %s364_s30 = scalar_lea.vmem %s32_s22, 2048  ;;  %p369_p4 = scmp.lt.s32.totalorder %s32_s22, %s32_s22 }
   0xb   :  { %p365_p3 = scmp.ne.s32.totalorder %s32_s22, %s364_s30  ;;  %p370_p5 = scmp.lt.s32.totalorder %s364_s30, %s364_s30 }
   0xd   :  { %p371_p6 = por %p370_p5, %p369_p4 }
   0xf   :  { %p372_p7 = pnand %p371_p6, %p365_p3 }
  0x11   :  { %375 = shalt.err (!%p372_p7)
}
  0x12   :  { %s495_s7 = smov 512   ;;  %s496_s8 = smov 32  }
  0x13   :  { %37 = dma.hbm_to_vmem [thread:$0]  %s622_s1, 2048, %s32_s22, [#allocation6], %s495_s7, %s495_s7, %s496_s8  }
  0x14   :  { %s497_s11 = smov [#allocation2]   ;;  %s498_s13 = smov [#allocation7]  }
  0x15   :  { %s22_s12 = sshll.u32 %s497_s11, 4  ;;  %s46_s14 = sshll.u32 %s498_s13, 4  ;;  %s23_s12 = int_to_ptr.vmem [resolvable:$true] %s22_s12  ;;  %s47_s14 = int_to_ptr.vmem [resolvable:$true] %s46_s14 }
  0x16   :  { %s376_s17 = scalar_lea.hbm %s621_s0, 128 }
  0x17   :  { %p377_p8 = scmp.ne.s32.totalorder %s621_s0, %s376_s17  ;;  %p380_p9 = scmp.lt.u32.totalorder %s376_s17, %s621_s0 }
  0x19   :  { %p382_p10 = pnand %p380_p9, %p377_p8 }
  0x1b   :  { %385 = shalt.err (!%p382_p10)
}
  0x1c   :  { %s386_s1 = scalar_lea.vmem %s23_s12, 128  ;;  %p391_p12 = scmp.lt.s32.totalorder %s23_s12, %s23_s12 }
  0x1d   :  { %p387_p11 = scmp.ne.s32.totalorder %s23_s12, %s386_s1  ;;  %p392_p13 = scmp.lt.s32.totalorder %s386_s1, %s386_s1 }
  0x1f   :  { %p393_p0 = por %p392_p13, %p391_p12 }
  0x21   :  { %p394_p1 = pnand %p393_p0, %p387_p11 }
  0x23   :  { %397 = shalt.err (!%p394_p1)
}
  0x24   :  { %25 = dma.hbm_to_vmem [thread:$0]  %s621_s0, 128, %s23_s12, [#allocation3]  }
  0x25   :  { %s398_s26 = scalar_lea.hbm %s624_s3, 256 }
  0x26   :  { %p399_p2 = scmp.ne.s32.totalorder %s624_s3, %s398_s26  ;;  %p402_p3 = scmp.lt.u32.totalorder %s398_s26, %s624_s3 }
  0x28   :  { %p404_p4 = pnand %p402_p3, %p399_p2 }
  0x2a   :  { %407 = shalt.err (!%p404_p4)
}
  0x2b   :  { %s408_s7 = scalar_lea.vmem %s47_s14, 256  ;;  %p413_p6 = scmp.lt.s32.totalorder %s47_s14, %s47_s14 }
  0x2c   :  { %p409_p5 = scmp.ne.s32.totalorder %s47_s14, %s408_s7  ;;  %p414_p7 = scmp.lt.s32.totalorder %s408_s7, %s408_s7 }
  0x2e   :  { %p415_p8 = por %p414_p7, %p413_p6 }
  0x30   :  { %p416_p9 = pnand %p415_p8, %p409_p5 }
  0x32   :  { %419 = shalt.err (!%p416_p9)
}
  0x33   :  { %49 = dma.hbm_to_vmem [thread:$0]  %s624_s3, 256, %s47_s14, [#allocation6]  }
  0x34   :  { %486 = dma.done.wait [#allocation3], 128  }
  0x35   :  { %487 = vsyncadd [#allocation3], 4294967168 }
  0x36   :  { %488 = dma.done.wait [#allocation6], 2304  }
  0x37   :  { %489 = vsyncadd [#allocation6], 4294964992  ;;  %v499_v0 = vmov 0.0   ;;  %v63_v1 = vld [vmem:[#allocation5 + $0x18] sm:$0xff]  ;;  %v62_v3 = vld [vmem:[#allocation5 + $0x10] sm:$0xff]  ;;  %vm98_vm0 = vcmask 261120   ;;  %v78_v26 = vlaneseq }
  0x38   :  { %237 = vmatprep.mubr.f32.mxu1 %v499_v0  ;;  %166 = vmatprep.mubr.f32.mxu0 %v499_v0  ;;  %v67_v2 = vld [vmem:[#allocation5 + $0x38] sm:$0xff]  ;;  %v66_v5 = vld [vmem:[#allocation5 + $0x30] sm:$0xff]  ;;  %v61_v12 = vld [vmem:[#allocation5 + $0x8] sm:$0xff]  ;;  %s500_s10 = smov [#allocation8]  }
  0x39   :  { %v329_v4 = vpack.c.bf16 %v67_v2, %v63_v1  ;;  %v71_v6 = vld [vmem:[#allocation5 + $0x58] sm:$0xff]  ;;  %v331_v8 = vpack.c.bf16 %v66_v5, %v62_v3  ;;  %v70_v10 = vld [vmem:[#allocation5 + $0x50] sm:$0xff]  ;;  %v65_v13 = vld [vmem:[#allocation5 + $0x28] sm:$0xff]  ;;  %v79_v27 = vshrl.u32 %v78_v26, 7  ;;  %s282_s11 = sshll.u32 %s500_s10, 4  ;;  %s283_s11 = int_to_ptr.vmem [resolvable:$true] %s282_s11 }
  0x3a   :  { %v75_v7 = vld [vmem:[#allocation5 + $0x78] sm:$0xff]  ;;  %v74_v11 = vld [vmem:[#allocation5 + $0x70] sm:$0xff]  ;;  %v60_v14 = vld [vmem:[#allocation5] sm:$0xff]  ;;  %v321_v16 = vpack.c.bf16 %v65_v13, %v61_v12  ;;  %p425_p11 = scmp.lt.s32.totalorder %s283_s11, %s283_s11 }
  0x3b   :  { %v333_v9 = vpack.c.bf16 %v75_v7, %v71_v6  ;;  %330 = vmatprep.subr.bf16.mxu1 %v329_v4  ;;  %v335_v15 = vpack.c.bf16 %v74_v11, %v70_v10  ;;  %v64_v17 = vld [vmem:[#allocation5 + $0x20] sm:$0xff]  ;;  %v69_v18 = vld [vmem:[#allocation5 + $0x48] sm:$0xff]  ;;  %v59_v25 = vld [vmem:[#allocation2] sm:$0xff]  ;;  %v88_v28 = vsub.s32 2, %v79_v27  ;;  %v92_v30 = vsub.s32 3, %v79_v27 }
  0x3c   :  { %332 = vmatpush1.bf16.msra.mxu1 %v331_v8  ;;  %v73_v19 = vld [vmem:[#allocation5 + $0x68] sm:$0xff]  ;;  %v323_v20 = vpack.c.bf16 %v64_v17, %v60_v14  ;;  %v68_v22 = vld [vmem:[#allocation5 + $0x40] sm:$0xff]  ;;  %322 = vmatprep.subr.bf16.mxu0 %v321_v16  ;;  %v76_v29 = vld [vmem:[%s623_s2] sm:$0xf]  ;;  %v80_v31 = vsub.s32 0, %v79_v27  ;;  %v84_v33 = vsub.s32 1, %v79_v27 }
  0x3d   :  { %334 = vmatprep.subr.bf16.mxu1 %v333_v9  ;;  %v325_v21 = vpack.c.bf16 %v73_v19, %v69_v18  ;;  %v72_v23 = vld [vmem:[#allocation5 + $0x60] sm:$0xff]  ;;  %v89_v32 = vrot.slane %v76_v29, %v88_v28  ;;  %v93_v34 = vrot.slane %v76_v29, %v92_v30  ;;  %s420_s2 = scalar_lea.vmem %s283_s11, 256 }
  0x3e   :  { %324 = vmatpush1.bf16.msra.mxu0 %v323_v20  ;;  %v327_v24 = vpack.c.bf16 %v72_v23, %v68_v22  ;;  %v81_v36 = vrot.slane %v76_v29, %v80_v31  ;;  %v85_v39 = vrot.slane %v76_v29, %v84_v33  ;;  %p421_p10 = scmp.ne.s32.totalorder %s283_s11, %s420_s2  ;;  %p426_p12 = scmp.lt.s32.totalorder %s420_s2, %s420_s2 }
  0x3f   :  { %326 = vmatprep.subr.bf16.mxu0 %v325_v21 }
  0x40   :  { %336 = vmatpush1.bf16.msra.mxu1 %v335_v15  ;;  %p427_p13 = por %p426_p12, %p425_p11 }
  0x42   :  { %328 = vmatpush1.bf16.msra.mxu0 %v327_v24  ;;  %p428_p0 = pnand %p427_p13, %p421_p10 }
  0x43   :  { %320 = vmatmul.mubr.msk.f32.vlgmr.msra.gmra.mrb[0].mxu1 %vm98_vm0, %v59_v25 }
  0x45   :  { %319 = vmatmul.mubr.msk.f32.vlgmr.msra.gmra.mrb[0].mxu0 %vm98_vm0, %v59_v25 }
 0x116   :  { %v239_v35 = vpop.f32.mrb[0].mxu1 }
 0x117   :  { %v240_v37 = vadd.f32 %v239_v35, %v89_v32  ;;  %v241_v38 = vpop.f32.mrb[1].mxu1 }
 0x118   :  { %v242_v40 = vadd.f32 %v241_v38, %v93_v34  ;;  %v168_v42 = vpop.f32.mrb[0].mxu0 }
 0x119   :  { %v246_v41 = vmul.f32 1.442695, %v240_v37  ;;  %v577_v44 = vadd.f32 %v168_v42, %v81_v36  ;;  %v170_v45 = vpop.f32.mrb[1].mxu0 }
 0x11a   :  { %v248_v43 = vmul.f32 1.442695, %v242_v40  ;;  %v579_v46 = vadd.f32 %v170_v45, %v85_v39 }
 0x11b   :  { %346 = vpow2.f32 %v246_v41  ;;  %244 = vst [vmem:[#allocation8] sm:$0xff] %v577_v44 }
 0x11c   :  { %348 = vpow2.f32 %v248_v43  ;;  %245 = vst [vmem:[#allocation8 + $0x8] sm:$0xff] %v579_v46 }
 0x11d   :  { %431 = shalt.err (!%p428_p0)
}
 0x11e   :  { %s432_s14 = scalar_lea.hbm %s625_s4, 256 }
 0x11f   :  { %p433_p1 = scmp.ne.s32.totalorder %s625_s4, %s432_s14  ;;  %p436_p2 = scmp.lt.u32.totalorder %s432_s14, %s625_s4 }
 0x121   :  { %p438_p3 = pnand %p436_p2, %p433_p1 }
 0x123   :  { %441 = shalt.err (!%p438_p3)
}
 0x124   :  { %285 = dma.vmem_to_hbm [thread:$0]  %s283_s11, 256, %s625_s4, [#allocation4]  }
 0x125   :  { %s501_s21 = smov [#allocation9]   ;;  %v347_v47 = vpop.eup %346 }
 0x126   :  { %s292_s1 = sshll.u32 %s501_s21, 4  ;;  %v349_v48 = vpop.eup %348  ;;  %v250_v49 = vadd.f32 0.0001, %v347_v47  ;;  %s293_s1 = int_to_ptr.vmem [resolvable:$true] %s292_s1 }
 0x127   :  { %v251_v50 = vadd.f32 0.0001, %v349_v48  ;;  %s442_s22 = scalar_lea.vmem %s293_s1, 256  ;;  %p447_p5 = scmp.lt.s32.totalorder %s293_s1, %s293_s1 }
 0x128   :  { %252 = vst [vmem:[#allocation9] sm:$0xff] %v250_v49  ;;  %350 = vrsqrt.f32 %v250_v49  ;;  %p443_p4 = scmp.ne.s32.totalorder %s293_s1, %s442_s22  ;;  %p448_p6 = scmp.lt.s32.totalorder %s442_s22, %s442_s22 }
 0x129   :  { %253 = vst [vmem:[#allocation9 + $0x8] sm:$0xff] %v251_v50  ;;  %352 = vrsqrt.f32 %v251_v50 }
 0x12a   :  { %p449_p7 = por %p448_p6, %p447_p5 }
 0x12c   :  { %p450_p8 = pnand %p449_p7, %p443_p4 }
 0x12e   :  { %453 = shalt.err (!%p450_p8)
}
 0x12f   :  { %s454_s24 = scalar_lea.hbm %s626_s5, 256 }
 0x130   :  { %p455_p9 = scmp.ne.s32.totalorder %s626_s5, %s454_s24  ;;  %p458_p10 = scmp.lt.u32.totalorder %s454_s24, %s626_s5 }
 0x132   :  { %p460_p11 = pnand %p458_p10, %p455_p9 }
 0x134   :  { %463 = shalt.err (!%p460_p11)
}
 0x135   :  { %295 = dma.vmem_to_hbm [thread:$0]  %s293_s1, 256, %s626_s5, [#allocation10]   ;;  %v351_v51 = vpop.eup %350  ;;  %vm256_vm1 = vcmp.eq.f32.partialorder %v250_v49, inf  ;;  %v259_v54 = vand.u32 2147483648, %v250_v49  ;;  %v268_v55 = vld [vmem:[#allocation7] sm:$0xff]  ;;  %vm258_vm2 = vcmp.eq.f32.partialorder %v250_v49, 0.0 }
 0x136   :  { %v353_v52 = vpop.eup %352  ;;  %v255_v53 = vmul.f32 %v351_v51, %v250_v49  ;;  %vm263_vm3 = vcmp.eq.f32.partialorder %v251_v50, inf  ;;  %v266_v58 = vand.u32 2147483648, %v251_v50  ;;  %v269_v59 = vld [vmem:[#allocation7 + $0x8] sm:$0xff]  ;;  %vm265_vm4 = vcmp.eq.f32.partialorder %v251_v50, 0.0  ;;  %s502_s7 = smov [#allocation11]  }
 0x137   :  { %v262_v56 = vmul.f32 %v353_v52, %v251_v50  ;;  %s302_s0 = sshll.u32 %s502_s7, 4  ;;  %s303_s0 = int_to_ptr.vmem [resolvable:$true] %s302_s0 }
 0x138   :  { %v257_v57 = vsel %vm256_vm1, %v250_v49, %v255_v53  ;;  %s464_s5 = scalar_lea.vmem %s303_s0, 256  ;;  %p469_p13 = scmp.lt.s32.totalorder %s303_s0, %s303_s0 }
 0x139   :  { %v260_v60 = vsel %vm258_vm2, %v259_v54, %v257_v57  ;;  %v264_v61 = vsel %vm263_vm3, %v251_v50, %v262_v56  ;;  %p465_p12 = scmp.ne.s32.totalorder %s303_s0, %s464_s5  ;;  %p470_p0 = scmp.lt.s32.totalorder %s464_s5, %s464_s5 }
 0x13a   :  { %v270_v62 = vmul.f32 %v268_v55, %v260_v60  ;;  %v267_v63 = vsel %vm265_vm4, %v266_v58, %v264_v61 }
 0x13b   :  { %v271_v0 = vmul.f32 %v269_v59, %v267_v63  ;;  %p471_p1 = por %p470_p0, %p469_p13 }
 0x13c   :  { %v272_v1 = vadd.f32 %v270_v62, %v577_v44 }
 0x13d   :  { %v273_v2 = vadd.f32 %v271_v0, %v579_v46  ;;  %p472_p2 = pnand %p471_p1, %p465_p12 }
 0x13e   :  { %274 = vst [vmem:[#allocation11] sm:$0xff] %v272_v1 }
 0x13f   :  { %275 = vst [vmem:[#allocation11 + $0x8] sm:$0xff] %v273_v2 }
 0x140   :  { %475 = shalt.err (!%p472_p2)
}
 0x141   :  { %s476_s9 = scalar_lea.hbm %s627_s6, 256 }
 0x142   :  { %p477_p3 = scmp.ne.s32.totalorder %s627_s6, %s476_s9  ;;  %p480_p4 = scmp.lt.u32.totalorder %s476_s9, %s627_s6 }
 0x144   :  { %p482_p5 = pnand %p480_p4, %p477_p3 }
 0x146   :  { %485 = shalt.err (!%p482_p5)
}
 0x147   :  { %305 = dma.vmem_to_hbm [thread:$0]  %s303_s0, 256, %s627_s6, [#allocation10]  }
 0x148   :  { %490 = dma.done.wait [#allocation4], 256  }
 0x149   :  { %491 = vsyncadd [#allocation4], 4294967040 }
 0x14a   :  { %492 = dma.done.wait [#allocation10], 512  }
 0x14b   :  { %493 = vsyncadd [#allocation10], 4294966784 }
 0x14c   :  { %315 = vsyncpa [#allocation3], 1 }
 0x14d   :  { %316 = vsyncpa [#allocation6], 1 }
 0x14e   :  { %317 = vsyncpa [#allocation4], 1 }
 0x14f   :  { %318 = vsyncpa [#allocation10], 1 }

</bundles_post_ra>
